<compile_context>
chip_gen: v7x
topology: tpu7x:2x2x1
jax: 0.10.0
libtpu: 0.0.40
codegen_flags: <defaults>
</compile_context>

<pallas_src>
import functools

import jax
import jax.numpy as jnp
from jax import lax
from jax.experimental import pallas as pl
from jax.experimental.pallas import tpu as pltpu


def _round_up(x, m):
    return (x + m - 1) // m * m


def _sublane_multiple(dtype):
    itemsize = jnp.dtype(dtype).itemsize
    if itemsize >= 4:
        return 8
    if itemsize == 2:
        return 16
    return 32


def _per_input_tile_bytes():
    # Generation-aware DMA granularity: bigger steps on v7x-class chips (3.2 TB/s
    # HBM, 64 MiB VMEM/TC) to amortize the ~0.35us grid-step overhead; conservative
    # elsewhere (v5e's default scoped VMEM is only 16 MiB).
    try:
        info = pltpu.get_tpu_info()
        vmem = getattr(info, "vmem_capacity_bytes", 0) or 0
        if 0 < vmem <= 64 * 1024 * 1024:
            return 4 << 20
    except Exception:  # best-effort query only; fall back to a safe default
        pass
    return 2 << 20


def _mask_iou_sums_kernel(p_ref, t_ref, inter_ref, union_ref, *,
                          n_chunks, thw, hw, tiles_per_split, ragged, unroll):
    """Blocks: p/t (TM, THW) in native dtype; inter/union (TM, 128) f32 accumulators."""
    tm = inter_ref.shape[0]

    # Initialize the output-resident accumulators on the first reduction step.
    @pl.when(pl.program_id(2) == 0)
    def _():
        inter_ref[...] = jnp.zeros_like(inter_ref)
        union_ref[...] = jnp.zeros_like(union_ref)

    if ragged:
        # Only needed when HW % THW != 0: mask lanes past the real spatial extent
        # of the (single) ragged trailing tile. Cheap VPU filler in a mem-bound loop.
        spatial_block = pl.program_id(1) * tiles_per_split + pl.program_id(2)
        tile_base = spatial_block * thw
        lane_ids = lax.broadcasted_iota(jnp.int32, (tm, 128), 1)

    def chunk(c, accs):
        acc_min, acc_max = accs
        start = pl.multiple_of(c * 128, 128)
        pc = p_ref[:, pl.ds(start, 128)]
        tc = t_ref[:, pl.ds(start, 128)]
        # min/max in the native dtype (exact for bf16/f32); accumulate in f32.
        mn = jnp.minimum(pc, tc).astype(jnp.float32)
        mx = jnp.maximum(pc, tc).astype(jnp.float32)
        if ragged:
            valid = (tile_base + start + lane_ids) < hw
            mn = jnp.where(valid, mn, 0.0)
            mx = jnp.where(valid, mx, 0.0)
        return acc_min + mn, acc_max + mx

    zeros = jnp.zeros((tm, 128), jnp.float32)
    acc_min, acc_max = lax.fori_loop(0, n_chunks, chunk, (zeros, zeros),
                                     unroll=unroll)

    inter_ref[...] += acc_min
    union_ref[...] += acc_max


def mask_iou_loss(predict, target, eps=1e-7, *, input_dtype=None,
                  row_tile=None, lane_tile=None):
    """Pallas implementation of MaskIouLoss.forward. Returns float32 of shape [1]."""
    assert predict.ndim == 4 and predict.shape == target.shape
    N, K, H, W = predict.shape
    rows = N * K
    HW = H * W

    # Optional down-cast (off by default: a standalone cast pass would double HBM
    # traffic for this bandwidth-bound kernel unless it fuses into an upstream op).
    if input_dtype is not None and predict.dtype != input_dtype:
        predict = predict.astype(input_dtype)
    if input_dtype is not None and target.dtype != input_dtype:
        target = target.astype(input_dtype)

    p = predict.reshape(rows, HW)   # free row-major metadata reshape
    t = target.reshape(rows, HW)
    itemsize = jnp.dtype(p.dtype).itemsize
    sub = _sublane_multiple(p.dtype)

    # --- row tile -------------------------------------------------------------
    if row_tile is None:
        TM = min(64, _round_up(rows, sub))
    else:
        TM = _round_up(row_tile, sub)      # respect dtype's minimum sublane tile
    row_tiles = pl.cdiv(rows, TM)
    rows_out = row_tiles * TM              # output rows; padding rows never read

    # --- spatial tile -----------------------------------------------------------
    if lane_tile is None:
        tile_bytes = _per_input_tile_bytes()
        tgt_lanes = max(512, (tile_bytes // (TM * itemsize)) // 128 * 128)
        THW = min(_round_up(HW, 128), tgt_lanes, 32768)
    else:
        THW = _round_up(lane_tile, 128)
    n_hw_tiles = pl.cdiv(HW, THW)
    ragged = (HW % THW) != 0

    # 2-way parallel split of the spatial reduction keeps both v7x TensorCores busy
    # when N*K yields only one row tile; harmless on single-TC v5e/v6e (just another
    # grid axis). Only split when the tile count divides evenly.
    if row_tiles == 1 and n_hw_tiles >= 2 and n_hw_tiles % 2 == 0:
        splits = 2
    else:
        splits = 1
    tiles_per_split = n_hw_tiles // splits

    n_chunks = THW // 128
    unroll = max(1, min(n_chunks, 4))      # cap vreg pressure (2x(TM,128) f32 carries)
    grid = (row_tiles, splits, tiles_per_split)

    kernel = functools.partial(
        _mask_iou_sums_kernel, n_chunks=n_chunks, thw=THW, hw=HW,
        tiles_per_split=tiles_per_split, ragged=ragged, unroll=unroll)

    cost = pl.CostEstimate(
        flops=4 * rows * HW,               # min + max + 2 accumulating adds
        transcendentals=0,
        bytes_accessed=2 * rows * HW * itemsize + 2 * rows_out * splits * 128 * 4,
    )

    inter_l, union_l = pl.pallas_call(
        kernel,
        out_shape=(
            jax.ShapeDtypeStruct((rows_out, splits * 128), jnp.float32),
            jax.ShapeDtypeStruct((rows_out, splits * 128), jnp.float32),
        ),
        grid_spec=pltpu.PrefetchScalarGridSpec(
            num_scalar_prefetch=0,
            grid=grid,
            in_specs=[
                pl.BlockSpec((TM, THW),
                             lambda i, s, j: (i, s * tiles_per_split + j)),
                pl.BlockSpec((TM, THW),
                             lambda i, s, j: (i, s * tiles_per_split + j)),
            ],
            out_specs=(
                pl.BlockSpec((TM, 128), lambda i, s, j: (i, s)),
                pl.BlockSpec((TM, 128), lambda i, s, j: (i, s)),
            ),
        ),
        compiler_params=pltpu.CompilerParams(
            dimension_semantics=("parallel", "parallel", "arbitrary"),
        ),
        cost_estimate=cost,
    )(p, t)

    # Single cross-lane reduce + tiny O(N*K) epilogue in plain JAX.
    inter = inter_l[:rows].sum(axis=-1).reshape(N, K)
    union = union_l[:rows].sum(axis=-1).reshape(N, K)

    # mask_iou with size_average=True: mean over K of (inter+eps)/(union+eps)
    iou_per_n = jnp.sum((inter + eps) / (union + eps), axis=-1) / K      # (N,)
    # forward: loss = sum_n (1 - iou_n) / N, kept as shape [1] like torch.zeros(1)
    loss = jnp.sum(1.0 - iou_per_n) / N
    return loss.reshape(1).astype(jnp.float32)


def _mask_iou_loss_ref(predict, target, eps=1e-7):
    # Pure-JAX reference mirroring the PyTorch module (f32 accumulation).
    N, K, H, W = predict.shape
    p = predict.astype(jnp.float32)
    t = target.astype(jnp.float32)
    inter = jnp.minimum(p, t).sum(axis=(2, 3))
    union = jnp.maximum(p, t).sum(axis=(2, 3))
    iou_per_n = jnp.sum((inter + eps) / (union + eps), axis=-1) / K
    return (jnp.sum(1.0 - iou_per_n) / N).reshape(1)


if __name__ == "__main__":
    key = jax.random.PRNGKey(0)

    def _check(N, K, H, W, k, dtype=jnp.float32, tol=1e-5, **kw):
        kp, kt = jax.random.split(k)
        predict = jax.nn.sigmoid(jax.random.normal(kp, (N, K, H, W), dtype=jnp.float32))
        target = (jax.random.uniform(kt, (N, K, H, W)) > 0.5).astype(jnp.float32)
        predict = predict.astype(dtype)
        target = target.astype(dtype)
        loss = mask_iou_loss(predict, target, **kw)
        jax.block_until_ready(loss)
        ref = _mask_iou_loss_ref(predict, target)
        assert loss.shape == (1,) and loss.dtype == jnp.float32
        assert jnp.allclose(loss, ref, atol=tol, rtol=tol), (loss, ref)

    keys = jax.random.split(key, 5)
    # Primary small case matching the module's NCHW layout (f32, no wrapper pass).
    _check(2, 4, 16, 16, keys[0])
    # Non-aligned rows / spatial extent exercise the ragged-block + lane-mask path.
    _check(2, 3, 10, 13, keys[1])
    # Forced small tiles exercise the multi-row-tile grid + cross-tile accumulator path.
    _check(2, 16, 32, 32, keys[2], row_tile=8, lane_tile=256)
    # Single row tile with an even spatial tile count exercises the 2-way parallel split.
    _check(1, 4, 32, 32, keys[3], lane_tile=256)
    # bf16 inputs exercise the packed bf16 min/max path and the 16-row sublane tile.
    _check(2, 4, 16, 16, keys[4], dtype=jnp.bfloat16, tol=2e-3)

    print("KERNEL_OK")
</pallas_src>

<mosaic_0001>
module attributes {stable_mosaic.version = 11 : i64} {
  func.func @_mask_iou_sums_kernel(%arg0: i32, %arg1: i32, %arg2: i32, %arg3: memref<8x256xf32, #tpu.memory_space<vmem>>, %arg4: memref<8x256xf32, #tpu.memory_space<vmem>>, %arg5: memref<8x128xf32, #tpu.memory_space<vmem>>, %arg6: memref<8x128xf32, #tpu.memory_space<vmem>>) attributes {dimension_semantics = [#tpu.dimension_semantics<parallel>, #tpu.dimension_semantics<parallel>, #tpu.dimension_semantics<arbitrary>], iteration_bounds = array<i64: 1, 1, 1>, scalar_prefetch = 0 : i64, scratch_operands = 0 : i64, tpu.core_type = #tpu.core_type<tc>, window_params = [{transform_indices = @transform_0, window_bounds = array<i64: 8, 256>}, {transform_indices = @transform_1, window_bounds = array<i64: 8, 256>}, {transform_indices = @transform_2, window_bounds = array<i64: 8, 128>}, {transform_indices = @transform_3, window_bounds = array<i64: 8, 128>}]} {
    %c0_i32 = arith.constant 0 : i32
    %0 = arith.cmpi eq, %arg2, %c0_i32 : i32
    %1 = arith.extui %0 : i1 to i32
    %c0_i32_0 = arith.constant 0 : i32
    %2 = arith.cmpi ne, %1, %c0_i32_0 : i32
    scf.if %2 {
      %cst_14 = arith.constant 0.000000e+00 : f32
      %30 = vector.broadcast %cst_14 : f32 to vector<8x128xf32>
      %c0_15 = arith.constant 0 : index
      %c0_16 = arith.constant 0 : index
      %31 = vector.load %arg5[%c0_15, %c0_16] : memref<8x128xf32, #tpu.memory_space<vmem>>, vector<8x128xf32>
      tpu.vector_store %arg5[%c0_15, %c0_16], %30 {strides = array<i32>} : memref<8x128xf32, #tpu.memory_space<vmem>>, vector<8x128xf32>,
      %cst_17 = arith.constant 0.000000e+00 : f32
      %32 = vector.broadcast %cst_17 : f32 to vector<8x128xf32>
      %c0_18 = arith.constant 0 : index
      %c0_19 = arith.constant 0 : index
      %33 = vector.load %arg6[%c0_18, %c0_19] : memref<8x128xf32, #tpu.memory_space<vmem>>, vector<8x128xf32>
      tpu.vector_store %arg6[%c0_18, %c0_19], %32 {strides = array<i32>} : memref<8x128xf32, #tpu.memory_space<vmem>>, vector<8x128xf32>,
    } else {
    }
    %cst = arith.constant 0.000000e+00 : f32
    %3 = vector.broadcast %cst : f32 to vector<8x128xf32>
    %c0_i32_1 = arith.constant 0 : i32
    %c128_i32 = arith.constant 128 : i32
    %4 = arith.muli %c0_i32_1, %c128_i32 : i32
    %5 = tpu.assume_multiple %4, 128 : i32
    %c0 = arith.constant 0 : index
    %6 = arith.index_cast %5 : i32 to index
    %7 = vector.load %arg3[%c0, %6] : memref<8x256xf32, #tpu.memory_space<vmem>>, vector<8x128xf32>
    %c0_2 = arith.constant 0 : index
    %8 = arith.index_cast %5 : i32 to index
    %9 = vector.load %arg4[%c0_2, %8] : memref<8x256xf32, #tpu.memory_space<vmem>>, vector<8x128xf32>
    %10 = arith.minimumf %7, %9 : vector<8x128xf32>
    %11 = arith.maximumf %7, %9 : vector<8x128xf32>
    %12 = arith.addf %3, %10 : vector<8x128xf32>
    %13 = arith.addf %3, %11 : vector<8x128xf32>
    %c1_i32 = arith.constant 1 : i32
    %c128_i32_3 = arith.constant 128 : i32
    %14 = arith.muli %c1_i32, %c128_i32_3 : i32
    %15 = tpu.assume_multiple %14, 128 : i32
    %c0_4 = arith.constant 0 : index
    %16 = arith.index_cast %15 : i32 to index
    %17 = vector.load %arg3[%c0_4, %16] : memref<8x256xf32, #tpu.memory_space<vmem>>, vector<8x128xf32>
    %c0_5 = arith.constant 0 : index
    %18 = arith.index_cast %15 : i32 to index
    %19 = vector.load %arg4[%c0_5, %18] : memref<8x256xf32, #tpu.memory_space<vmem>>, vector<8x128xf32>
    %20 = arith.minimumf %17, %19 : vector<8x128xf32>
    %21 = arith.maximumf %17, %19 : vector<8x128xf32>
    %22 = arith.addf %12, %20 : vector<8x128xf32>
    %23 = arith.addf %13, %21 : vector<8x128xf32>
    %c2_i32 = arith.constant 2 : i32
    %c0_6 = arith.constant 0 : index
    %c0_7 = arith.constant 0 : index
    %24 = vector.load %arg5[%c0_6, %c0_7] : memref<8x128xf32, #tpu.memory_space<vmem>>, vector<8x128xf32>
    %25 = arith.addf %24, %22 : vector<8x128xf32>
    %c0_8 = arith.constant 0 : index
    %c0_9 = arith.constant 0 : index
    %26 = vector.load %arg5[%c0_8, %c0_9] : memref<8x128xf32, #tpu.memory_space<vmem>>, vector<8x128xf32>
    tpu.vector_store %arg5[%c0_8, %c0_9], %25 {strides = array<i32>} : memref<8x128xf32, #tpu.memory_space<vmem>>, vector<8x128xf32>,
    %c0_10 = arith.constant 0 : index
    %c0_11 = arith.constant 0 : index
    %27 = vector.load %arg6[%c0_10, %c0_11] : memref<8x128xf32, #tpu.memory_space<vmem>>, vector<8x128xf32>
    %28 = arith.addf %27, %23 : vector<8x128xf32>
    %c0_12 = arith.constant 0 : index
    %c0_13 = arith.constant 0 : index
    %29 = vector.load %arg6[%c0_12, %c0_13] : memref<8x128xf32, #tpu.memory_space<vmem>>, vector<8x128xf32>
    tpu.vector_store %arg6[%c0_12, %c0_13], %28 {strides = array<i32>} : memref<8x128xf32, #tpu.memory_space<vmem>>, vector<8x128xf32>,
    return
  }
  func.func @transform_0(%arg0: i32, %arg1: i32, %arg2: i32) -> (i32, i32) {
    %c1_i32 = arith.constant 1 : i32
    %0 = arith.muli %arg1, %c1_i32 : i32
    %1 = arith.addi %0, %arg2 : i32
    %c0_i32 = arith.constant 0 : i32
    return %arg0, %1 : i32, i32
  }
  func.func @transform_1(%arg0: i32, %arg1: i32, %arg2: i32) -> (i32, i32) {
    %c1_i32 = arith.constant 1 : i32
    %0 = arith.muli %arg1, %c1_i32 : i32
    %1 = arith.addi %0, %arg2 : i32
    %c0_i32 = arith.constant 0 : i32
    return %arg0, %1 : i32, i32
  }
  func.func @transform_2(%arg0: i32, %arg1: i32, %arg2: i32) -> (i32, i32) {
    %c0_i32 = arith.constant 0 : i32
    return %arg0, %arg1 : i32, i32
  }
  func.func @transform_3(%arg0: i32, %arg1: i32, %arg2: i32) -> (i32, i32) {
    %c0_i32 = arith.constant 0 : i32
    return %arg0, %arg1 : i32, i32
  }
}

</mosaic_0001>

<bundles_post_ra>
// kernel: tpu_custom_call.1
= control target key start
LH: loop header
LB: loop body
LE: loop exit
PB: predicated region body
PF: predicated region fallthrough
CT: control target
= control target key end

     0   :  { %9 = vsyncpa [#allocation3], 0  ;;  %s280_s0 = inlined_call_operand.hbm [shape: f32[8,256], index: 0, kind: input, shape index: {}]   ;;  %s281_s1 = inlined_call_operand.hbm [shape: f32[8,256], index: 1, kind: input, shape index: {}]   ;;  %s282_s2 = inlined_call_operand.hbm [shape: f32[8,128], index: 2, kind: output, shape index: {0}]   ;;  %s283_s3 = inlined_call_operand.hbm [shape: f32[8,128], index: 3, kind: output, shape index: {1}]  }
   0x1   :  { %10 = vsyncpa [#allocation6], 0 }
   0x2   :  { %11 = vsyncpa [#allocation4], 0 }
   0x3   :  { %12 = vsyncpa [#allocation9], 0  ;;  %s208_s12 = smov [#allocation2]   ;;  %s209_s14 = smov [#allocation5]  }
   0x4   :  { %s23_s13 = sshll.u32 %s208_s12, 4  ;;  %s37_s15 = sshll.u32 %s209_s14, 4  ;;  %s24_s13 = int_to_ptr.vmem [resolvable:$true] %s23_s13  ;;  %s38_s15 = int_to_ptr.vmem [resolvable:$true] %s37_s15 }
   0x5   :  { %s112_s18 = scalar_lea.hbm %s280_s0, 256 }
   0x6   :  { %p113_p0 = scmp.ne.s32.totalorder %s280_s0, %s112_s18  ;;  %p116_p1 = scmp.lt.u32.totalorder %s112_s18, %s280_s0 }
   0x8   :  { %p118_p2 = pnand %p116_p1, %p113_p0 }
   0xa   :  { %121 = shalt.err (!%p118_p2)
}
   0xb   :  { %s122_s23 = scalar_lea.vmem %s24_s13, 256  ;;  %p127_p4 = scmp.lt.s32.totalorder %s24_s13, %s24_s13 }
   0xc   :  { %p123_p3 = scmp.ne.s32.totalorder %s24_s13, %s122_s23  ;;  %p128_p5 = scmp.lt.s32.totalorder %s122_s23, %s122_s23 }
   0xe   :  { %p129_p6 = por %p128_p5, %p127_p4 }
  0x10   :  { %p130_p7 = pnand %p129_p6, %p123_p3 }
  0x12   :  { %133 = shalt.err (!%p130_p7)
}
  0x13   :  { %26 = dma.hbm_to_vmem [thread:$0]  %s280_s0, 256, %s24_s13, [#allocation3]  }
  0x14   :  { %s134_s28 = scalar_lea.hbm %s281_s1, 256 }
  0x15   :  { %p135_p8 = scmp.ne.s32.totalorder %s281_s1, %s134_s28  ;;  %p138_p9 = scmp.lt.u32.totalorder %s134_s28, %s281_s1 }
  0x17   :  { %p140_p10 = pnand %p138_p9, %p135_p8 }
  0x19   :  { %143 = shalt.err (!%p140_p10)
}
  0x1a   :  { %s144_s6 = scalar_lea.vmem %s38_s15, 256  ;;  %p149_p12 = scmp.lt.s32.totalorder %s38_s15, %s38_s15 }
  0x1b   :  { %p145_p11 = scmp.ne.s32.totalorder %s38_s15, %s144_s6  ;;  %p150_p13 = scmp.lt.s32.totalorder %s144_s6, %s144_s6 }
  0x1d   :  { %p151_p0 = por %p150_p13, %p149_p12 }
  0x1f   :  { %p152_p1 = pnand %p151_p0, %p145_p11 }
  0x21   :  { %155 = shalt.err (!%p152_p1)
}
  0x22   :  { %40 = dma.hbm_to_vmem [thread:$0]  %s281_s1, 256, %s38_s15, [#allocation6]  }
  0x23   :  { %200 = dma.done.wait [#allocation3], 256  }
  0x24   :  { %201 = vsyncadd [#allocation3], 4294967040 }
  0x25   :  { %202 = dma.done.wait [#allocation6], 256  }
  0x26   :  { %203 = vsyncadd [#allocation6], 4294967040  ;;  %v57_v0 = vld [vmem:[#allocation2] sm:$0xff]  ;;  %v58_v1 = vld [vmem:[#allocation5] sm:$0xff]  ;;  %s210_s8 = smov [#allocation7]   ;;  %s211_s10 = smov [#allocation8]  }
  0x27   :  { %v64_v2 = vld [vmem:[#allocation2 + $0x8] sm:$0xff]  ;;  %v59_v3 = vmin.f32 %v57_v0, %v58_v1  ;;  %v66_v4 = vld [vmem:[#allocation5 + $0x8] sm:$0xff]  ;;  %v60_v5 = vmax.f32 %v57_v0, %v58_v1  ;;  %s83_s9 = sshll.u32 %s210_s8, 4  ;;  %s93_s11 = sshll.u32 %s211_s10, 4  ;;  %s84_s9 = int_to_ptr.vmem [resolvable:$true] %s83_s9  ;;  %s94_s11 = int_to_ptr.vmem [resolvable:$true] %s93_s11 }
  0x28   :  { %v67_v6 = vmin.f32 %v64_v2, %v66_v4  ;;  %v68_v7 = vmax.f32 %v64_v2, %v66_v4  ;;  %s156_s1 = scalar_lea.vmem %s84_s9, 128  ;;  %p161_p3 = scmp.lt.s32.totalorder %s84_s9, %s84_s9 }
  0x29   :  { %p157_p2 = scmp.ne.s32.totalorder %s84_s9, %s156_s1  ;;  %p162_p4 = scmp.lt.s32.totalorder %s156_s1, %s156_s1 }
  0x2a   :  { %v69_v8 = vadd.f32 %v67_v6, %v59_v3  ;;  %v70_v9 = vadd.f32 %v68_v7, %v60_v5 }
  0x2b   :  { %p163_p5 = por %p162_p4, %p161_p3 }
  0x2c   :  { %73 = vst [vmem:[#allocation7] sm:$0xff] %v69_v8  ;;  %76 = vst [vmem:[#allocation8] sm:$0xff] %v70_v9 }
  0x2d   :  { %p164_p6 = pnand %p163_p5, %p157_p2 }
  0x2f   :  { %167 = shalt.err (!%p164_p6)
}
  0x30   :  { %s168_s14 = scalar_lea.hbm %s282_s2, 128 }
  0x31   :  { %p169_p7 = scmp.ne.s32.totalorder %s282_s2, %s168_s14  ;;  %p172_p8 = scmp.lt.u32.totalorder %s168_s14, %s282_s2 }
  0x33   :  { %p174_p9 = pnand %p172_p8, %p169_p7 }
  0x35   :  { %177 = shalt.err (!%p174_p9)
}
  0x36   :  { %86 = dma.vmem_to_hbm [thread:$0]  %s84_s9, 128, %s282_s2, [#allocation4]  }
  0x37   :  { %s178_s21 = scalar_lea.vmem %s94_s11, 128  ;;  %p183_p11 = scmp.lt.s32.totalorder %s94_s11, %s94_s11 }
  0x38   :  { %p179_p10 = scmp.ne.s32.totalorder %s94_s11, %s178_s21  ;;  %p184_p12 = scmp.lt.s32.totalorder %s178_s21, %s178_s21 }
  0x3a   :  { %p185_p13 = por %p184_p12, %p183_p11 }
  0x3c   :  { %p186_p0 = pnand %p185_p13, %p179_p10 }
  0x3e   :  { %189 = shalt.err (!%p186_p0)
}
  0x3f   :  { %s190_s24 = scalar_lea.hbm %s283_s3, 128 }
  0x40   :  { %p191_p1 = scmp.ne.s32.totalorder %s283_s3, %s190_s24  ;;  %p194_p2 = scmp.lt.u32.totalorder %s190_s24, %s283_s3 }
  0x42   :  { %p196_p3 = pnand %p194_p2, %p191_p1 }
  0x44   :  { %199 = shalt.err (!%p196_p3)
}
  0x45   :  { %96 = dma.vmem_to_hbm [thread:$0]  %s94_s11, 128, %s283_s3, [#allocation9]  }
  0x46   :  { %204 = dma.done.wait [#allocation4], 128  }
  0x47   :  { %205 = vsyncadd [#allocation4], 4294967168 }
  0x48   :  { %206 = dma.done.wait [#allocation9], 128  }
  0x49   :  { %207 = vsyncadd [#allocation9], 4294967168 }
  0x4a   :  { %103 = vsyncpa [#allocation3], 1 }
  0x4b   :  { %104 = vsyncpa [#allocation6], 1 }
  0x4c   :  { %105 = vsyncpa [#allocation4], 1 }
  0x4d   :  { %106 = vsyncpa [#allocation9], 1 }

</bundles_post_ra>
